<compile_context>
chip_gen: v5e
topology: v5e:2x2
jax: 0.10.0
libtpu: 0.0.40
codegen_flags: <defaults>
</compile_context>

<pallas_src>
import math
import numpy as np
import jax
import jax.numpy as jnp
from jax.experimental import pallas as pl
from jax.experimental.pallas import tpu as pltpu

# Small-config constants (original module: n_pixels=784, n_time=200, input_freq=5).
N_PIXELS = 80
N_TIME = 64
INPUT_FREQ = 0.5   # reduced so the Gaussian envelope is non-degenerate at n_time=64
BATCH = 2
N_CLASSES = 10

P_PAD = 128        # pixel axis padded to one full lane tile
OUT_PAD = 128      # output padded to one full lane tile (sliced back to 10)
B_PAD = 8          # batch padded to one full sublane tile (unmasked vld/vst)


# ---------------------------------------------------------------------------
# Constant matrices built in plain numpy (one-time parameter setup).
# ---------------------------------------------------------------------------
def _idft_matrices(n):
    """Finv[p, m] = exp(+2*pi*i*p*m/n)/n, split into (real, imag)."""
    k = np.arange(n)
    ang = 2.0 * np.pi * np.outer(k, k) / n
    return (np.cos(ang) / n).astype(np.float32), (np.sin(ang) / n).astype(np.float32)


def _chunk_selector(n, n_chunks):
    """torch.chunk semantics: split_size = ceil(n / n_chunks), last chunk may be short."""
    split = -(-n // n_chunks)
    sel = np.zeros((n, n_chunks), dtype=np.float32)
    for c in range(n_chunks):
        lo, hi = c * split, min((c + 1) * split, n)
        sel[lo:hi, c] = 1.0
    return sel


# ---------------------------------------------------------------------------
# Pallas kernel: whole (padded) batch in one grid-less invocation.
#   x_ref    : (B_PAD, P_PAD)       f32   zero-padded pixel inputs
#   vwp2_ref : (1, 2*P_PAD)         f32   [Re(v*wproj)_pad | Im(v*wproj)_pad]
#   idft_ref : (2*P_PAD, P_PAD)     bf16  [[IDFT_re_pad], [-IDFT_im_pad]]
#   selw_ref : (P_PAD, OUT_PAD)     bf16  chunk_selector @ W_lin^T (zero-padded)
#   b_ref    : (1, OUT_PAD)         f32   bias (zero-padded)
#   o_ref    : (B_PAD, OUT_PAD)     f32
# ---------------------------------------------------------------------------
def scatter_kernel(x_ref, vwp2_ref, idft_ref, selw_ref, b_ref, o_ref):
    xb = x_ref[...]                                              # (B_PAD, P_PAD)
    x2 = jnp.concatenate([xb, xb], axis=1)                       # (B_PAD, 2*P_PAD)
    # s[p] = x[p] * (v[p]*wproj[p]); complex laid out as [re | im] along lanes.
    s2 = x2 * vwp2_ref[...]                                      # f32 on VPU (v5e-safe)

    # real(ifft(s)) as ONE fused real-block matmul (K = 2*P_PAD = 256).
    real = jnp.dot(s2.astype(jnp.bfloat16), idft_ref[...],
                   preferred_element_type=jnp.float32)           # (B_PAD, P_PAD)

    # |real| ~= sqrt(real^2 + 1e-20); chunk-sum + Linear fused into one matmul.
    mag = jnp.abs(real)
    o_ref[...] = (jnp.dot(mag.astype(jnp.bfloat16), selw_ref[...],
                          preferred_element_type=jnp.float32) + b_ref[...])


# ---------------------------------------------------------------------------
# One-time factory: does ALL parameter-only precompute, returns a jitted forward.
# ---------------------------------------------------------------------------
def make_scattering_classifier(v, scatter_re, scatter_im, w_lin, b_lin,
                               wf_re, wf_im):
    P = v.shape[0]
    assert P <= P_PAD and N_CLASSES <= OUT_PAD

    # wproj[p] = sum_k FFT(wf)[k] * scatter[k, p]; fold v in as well (parameter-only).
    wf_c = (wf_re + 1j * wf_im).astype(jnp.complex64)
    wfhat = jnp.fft.fft(wf_c)                                    # (T,)
    scatter_c = (scatter_re + 1j * scatter_im).astype(jnp.complex64)   # (T, P)
    vwp = v.astype(jnp.complex64) * (wfhat @ scatter_c)          # (P,), complex
    vwp2 = jnp.zeros((1, 2 * P_PAD), jnp.float32)
    vwp2 = vwp2.at[0, :P].set(jnp.real(vwp).astype(jnp.float32))
    vwp2 = vwp2.at[0, P_PAD:P_PAD + P].set(jnp.imag(vwp).astype(jnp.float32))

    # Real-output IDFT block matrix: real(ifft(s)) = [sr | si] @ [[ivr], [-ivi]].
    ivr, ivi = _idft_matrices(P)
    idft_blk = np.zeros((2 * P_PAD, P_PAD), np.float32)
    idft_blk[:P, :P] = ivr
    idft_blk[P_PAD:P_PAD + P, :P] = -ivi
    idft_blk = jnp.asarray(idft_blk, dtype=jnp.bfloat16)         # bf16 constant

    # Fold torch.chunk selector into the Linear layer (exact: both are linear).
    sel = _chunk_selector(P, N_CLASSES)                          # (P, 10)
    selw = jnp.asarray(sel) @ w_lin.T.astype(jnp.float32)        # (P, 10)
    selw_pad = (jnp.zeros((P_PAD, OUT_PAD), jnp.float32)
                .at[:P, :N_CLASSES].set(selw).astype(jnp.bfloat16))
    b_pad = jnp.zeros((1, OUT_PAD), jnp.float32).at[0, :N_CLASSES].set(
        b_lin.astype(jnp.float32))

    # Grid-less pallas_call: whole arrays live in VMEM, no pipeline machinery.
    vmem = pl.BlockSpec(memory_space=pltpu.MemorySpace.VMEM)
    call = pl.pallas_call(
        scatter_kernel,
        out_shape=jax.ShapeDtypeStruct((B_PAD, OUT_PAD), jnp.float32),
        in_specs=[vmem, vmem, vmem, vmem, vmem],
        out_specs=vmem,
    )
    # TODO(synk): for non-toy batch sizes, put the batch on a "parallel" grid axis
    # (constants' index_map returning the same block) so v7x's 2nd TensorCore is used.

    @jax.jit
    def forward(x_batch):
        B = x_batch.shape[0]
        x_pad = jnp.zeros((B_PAD, P_PAD), jnp.float32).at[:B, :P].set(
            x_batch.astype(jnp.float32))
        out = call(x_pad, vwp2, idft_blk, selw_pad, b_pad)
        return out[:B, :N_CLASSES]

    return forward


# ---------------------------------------------------------------------------
# Pure-JAX reference (mirrors the PyTorch forward exactly) for validation.
# ---------------------------------------------------------------------------
def reference_forward(x_batch, v, scatter_c, wf_c, w_lin, b_lin):
    P = x_batch.shape[1]
    split = -(-P // N_CLASSES)      # torch.chunk split size
    outs = []
    for x in x_batch:
        E_in = jnp.outer(x, wf_c).astype(jnp.complex64)           # modulated_input
        E_scaled = E_in * v[:, None]
        E_fft = jnp.fft.fft(E_scaled, axis=1)
        s = jnp.einsum('ij,ij->j', E_fft.T, scatter_c)
        r = jnp.real(jnp.fft.ifft(s))
        mag = jnp.sqrt(r * r + 1e-20)
        cs = jnp.stack([jnp.sum(mag[c * split: min((c + 1) * split, P)])
                        for c in range(N_CLASSES)])
        outs.append(cs)
    bt = jnp.stack(outs)
    return bt @ w_lin.T + b_lin


if __name__ == "__main__":
    key = jax.random.PRNGKey(0)
    k_x, k_v, k_sr, k_si, k_w, k_b = jax.random.split(key, 6)

    # time_domain_waveform = exp(1j * f * t) * exp(-500 * f^2 * t^2)
    t = np.linspace(-3.0, 3.0, N_TIME)
    wf = np.exp(1j * INPUT_FREQ * t) * np.exp(-500.0 * INPUT_FREQ ** 2 * t ** 2)
    wf_re = jnp.asarray(wf.real, dtype=jnp.float32)
    wf_im = jnp.asarray(wf.imag, dtype=jnp.float32)

    # Deterministic synthetic parameters (shapes from the module's __init__).
    x_batch = jax.random.uniform(k_x, (BATCH, N_PIXELS), dtype=jnp.float32)
    v = jax.random.uniform(k_v, (N_PIXELS,), dtype=jnp.float32)          # torch.rand(n_pixels)
    scatter_re = jax.random.normal(k_sr, (N_TIME, N_PIXELS), dtype=jnp.float32)
    scatter_im = jax.random.normal(k_si, (N_TIME, N_PIXELS), dtype=jnp.float32)
    bound = 1.0 / math.sqrt(N_CLASSES)
    w_lin = jax.random.uniform(k_w, (N_CLASSES, N_CLASSES),
                               dtype=jnp.float32, minval=-bound, maxval=bound)
    b_lin = jax.random.uniform(k_b, (N_CLASSES,),
                               dtype=jnp.float32, minval=-bound, maxval=bound)
    # TODO(synk): feedback_matrix / dfa_update are training-time only (not part of forward).

    fwd = make_scattering_classifier(v, scatter_re, scatter_im, w_lin, b_lin,
                                     wf_re, wf_im)
    out = jax.block_until_ready(fwd(x_batch))

    scatter_c = (scatter_re + 1j * scatter_im).astype(jnp.complex64)
    wf_c = (wf_re + 1j * wf_im).astype(jnp.complex64)
    ref = jax.block_until_ready(
        reference_forward(x_batch, v, scatter_c, wf_c, w_lin, b_lin))

    assert out.shape == (BATCH, N_CLASSES)
    assert bool(jnp.allclose(out, ref, rtol=2e-2, atol=2e-2)), (out, ref)
    print("KERNEL_OK")
</pallas_src>

<mosaic_0001>
module attributes {stable_mosaic.version = 11 : i64} {
  func.func @scatter_kernel(%arg0: memref<8x128xf32, #tpu.memory_space<vmem>>, %arg1: memref<1x256xf32, #tpu.memory_space<vmem>>, %arg2: memref<256x128xbf16, #tpu.memory_space<vmem>>, %arg3: memref<128x128xbf16, #tpu.memory_space<vmem>>, %arg4: memref<1x128xf32, #tpu.memory_space<vmem>>, %arg5: memref<8x128xf32, #tpu.memory_space<vmem>>) attributes {dimension_semantics = [], scalar_prefetch = 0 : i64, scratch_operands = 0 : i64, tpu.core_type = #tpu.core_type<tc>} {
    %c0 = arith.constant 0 : index
    %c0_0 = arith.constant 0 : index
    %0 = vector.load %arg0[%c0, %c0_0] : memref<8x128xf32, #tpu.memory_space<vmem>>, vector<8x128xf32>
    %1 = tpu.concatenate %0, %0 in 1 : vector<8x128xf32>, vector<8x128xf32> -> vector<8x256xf32>
    %c0_1 = arith.constant 0 : index
    %c0_2 = arith.constant 0 : index
    %2 = vector.load %arg1[%c0_1, %c0_2] : memref<1x256xf32, #tpu.memory_space<vmem>>, vector<1x256xf32>
    %3 = vector.broadcast %2 : vector<1x256xf32> to vector<8x256xf32>
    %4 = arith.mulf %1, %3 : vector<8x256xf32>
    %5 = arith.truncf %4 : vector<8x256xf32> to vector<8x256xbf16>
    %c0_3 = arith.constant 0 : index
    %c0_4 = arith.constant 0 : index
    %6 = vector.load %arg2[%c0_3, %c0_4] : memref<256x128xbf16, #tpu.memory_space<vmem>>, vector<256x128xbf16>
    %cst = arith.constant dense<0.000000e+00> : vector<8x128xf32>
    %7 = tpu.matmul %5, %6, %cst {dimension_numbers = #tpu.dot_dimension_numbers<[1], [0], [0], [1], [0, 0, 1, 1], [], []>} : vector<8x256xbf16>, vector<256x128xbf16>, vector<8x128xf32> -> vector<8x128xf32>
    %8 = math.absf %7 : vector<8x128xf32>
    %9 = arith.truncf %8 : vector<8x128xf32> to vector<8x128xbf16>
    %c0_5 = arith.constant 0 : index
    %c0_6 = arith.constant 0 : index
    %10 = vector.load %arg3[%c0_5, %c0_6] : memref<128x128xbf16, #tpu.memory_space<vmem>>, vector<128x128xbf16>
    %cst_7 = arith.constant dense<0.000000e+00> : vector<8x128xf32>
    %11 = tpu.matmul %9, %10, %cst_7 {dimension_numbers = #tpu.dot_dimension_numbers<[1], [0], [0], [1], [0, 0, 1, 1], [], []>} : vector<8x128xbf16>, vector<128x128xbf16>, vector<8x128xf32> -> vector<8x128xf32>
    %c0_8 = arith.constant 0 : index
    %c0_9 = arith.constant 0 : index
    %12 = vector.load %arg4[%c0_8, %c0_9] : memref<1x128xf32, #tpu.memory_space<vmem>>, vector<1x128xf32>
    %13 = vector.broadcast %12 : vector<1x128xf32> to vector<8x128xf32>
    %14 = arith.addf %11, %13 : vector<8x128xf32>
    %c0_10 = arith.constant 0 : index
    %c0_11 = arith.constant 0 : index
    %15 = vector.load %arg5[%c0_10, %c0_11] : memref<8x128xf32, #tpu.memory_space<vmem>>, vector<8x128xf32>
    tpu.vector_store %arg5[%c0_10, %c0_11], %14 {strides = array<i32>} : memref<8x128xf32, #tpu.memory_space<vmem>>, vector<8x128xf32>,
    return
  }
}

</mosaic_0001>

<bundles_post_ra>
// kernel: forward.1
= control target key start
LH: loop header
LB: loop body
LE: loop exit
PB: predicated region body
PF: predicated region fallthrough
CT: control target
= control target key end

     0   :  { %10 = vsyncpa [#allocation3], 0  ;;  %s536_s0 = inlined_call_operand.vmem [shape: f32[8,128], index: 0, kind: input, shape index: {}]   ;;  %s537_s1 = inlined_call_operand.vmem [shape: f32[1,256], index: 1, kind: input, shape index: {}]   ;;  %s538_s2 = inlined_call_operand.hbm [shape: bf16[256,128], index: 2, kind: input, shape index: {}]   ;;  %s539_s3 = inlined_call_operand.hbm [shape: bf16[128,128], index: 3, kind: input, shape index: {}]   ;;  %s540_s4 = inlined_call_operand.vmem [shape: f32[1,128], index: 4, kind: input, shape index: {}]   ;;  %s541_s5 = inlined_call_operand.vmem [shape: f32[8,128], index: 5, kind: output, shape index: {}]  }
   0x1   :  { %s20_s20 = sshll.u32 %s538_s2, 4  ;;  %s21_s20 = int_to_ptr.hbm [resolvable:$true] %s20_s20 }
   0x2   :  { %11 = vsyncpa [#allocation5], 0  ;;  %s484_s21 = smov [#allocation2]   ;;  %s33_s25 = sshll.u32 %s539_s3, 4  ;;  %s34_s25 = int_to_ptr.hbm [resolvable:$true] %s33_s25 }
   0x3   :  { %s22_s22 = sshll.u32 %s484_s21, 4  ;;  %s485_s26 = smov 64   ;;  %s23_s22 = int_to_ptr.vmem [resolvable:$true] %s22_s22 }
   0x4   :  { %s486_s27 = smov 4   ;;  %s487_s28 = smov [#allocation4]  }
   0x5   :  { %28 = dma.hbm_to_vmem [thread:$0]  %s21_s20, 2048, %s23_s22, [#allocation3], %s485_s26, %s485_s26, %s486_s27  }
   0x6   :  { %s35_s29 = sshll.u32 %s487_s28, 4  ;;  %s36_s29 = int_to_ptr.vmem [resolvable:$true] %s35_s29 }
   0x7   :  { %41 = dma.hbm_to_vmem [thread:$0]  %s34_s25, 1024, %s36_s29, [#allocation5], %s485_s26, %s485_s26, %s486_s27  }
   0x8   :  { %480 = dma.done.wait [#allocation3], 2048  }
   0x9   :  { %481 = vsyncadd [#allocation3], 4294965248 }
   0xa   :  { %482 = dma.done.wait [#allocation5], 1024  }
   0xb   :  { %483 = vsyncadd [#allocation5], 4294966272  ;;  %v410_v0 = vld [vmem:[#allocation2 + $0x38] sm:$0xff]  ;;  %v409_v2 = vld [vmem:[#allocation2 + $0x30] sm:$0xff] }
   0xc   :  { %v418_v1 = vld [vmem:[#allocation2 + $0x78] sm:$0xff]  ;;  %191 = vmatpush.bf16.msra.mxu0 %v410_v0  ;;  %v417_v3 = vld [vmem:[#allocation2 + $0x70] sm:$0xff]  ;;  %v408_v4 = vld [vmem:[#allocation2 + $0x28] sm:$0xff] }
   0xd   :  { %204 = vmatpush.bf16.msra.mxu1 %v418_v1  ;;  %v416_v5 = vld [vmem:[#allocation2 + $0x68] sm:$0xff]  ;;  %v426_v6 = vld [vmem:[#allocation4 + $0x38] sm:$0xff]  ;;  %v425_v7 = vld [vmem:[#allocation4 + $0x30] sm:$0xff] }
   0xe   :  { %287 = vmatpush.bf16.msra.mxu2 %v426_v6  ;;  %v407_v8 = vld [vmem:[#allocation2 + $0x20] sm:$0xff]  ;;  %v424_v10 = vld [vmem:[#allocation4 + $0x28] sm:$0xff]  ;;  %v406_v11 = vld [vmem:[#allocation2 + $0x18] sm:$0xff] }
   0xf   :  { %v415_v9 = vld [vmem:[#allocation2 + $0x60] sm:$0xff]  ;;  %v414_v12 = vld [vmem:[#allocation2 + $0x58] sm:$0xff]  ;;  %v405_v14 = vld [vmem:[#allocation2 + $0x10] sm:$0xff] }
  0x10   :  { %192 = vmatpush.bf16.msra.mxu0 %v409_v2  ;;  %v423_v13 = vld [vmem:[#allocation4 + $0x20] sm:$0xff]  ;;  %v413_v15 = vld [vmem:[#allocation2 + $0x50] sm:$0xff]  ;;  %v422_v17 = vld [vmem:[#allocation4 + $0x18] sm:$0xff] }
  0x11   :  { %205 = vmatpush.bf16.msra.mxu1 %v417_v3  ;;  %v53_v16 = vld [vmem:[%s537_s1] sm:$0x3]  ;;  %v404_v20 = vld [vmem:[#allocation2 + $0x8] sm:$0xff]  ;;  %v421_v23 = vld [vmem:[#allocation4 + $0x10] sm:$0xff] }
  0x12   :  { %288 = vmatpush.bf16.msra.mxu2 %v425_v7  ;;  %v55_v18 = vperm.slane %v53_v16, 0  ;;  %v56_v19 = vperm.slane %v53_v16, 1  ;;  %v412_v21 = vld [vmem:[#allocation2 + $0x48] sm:$0xff]  ;;  %v52_v22 = vld [vmem:[%s536_s0] sm:$0xff] }
  0x13   :  { %v403_v26 = vld [vmem:[#allocation2] sm:$0xff]  ;;  %v420_v30 = vld [vmem:[#allocation4 + $0x8] sm:$0xff] }
  0x14   :  { %193 = vmatpush.bf16.msra.mxu0 %v408_v4  ;;  %v59_v24 = vmul.f32 %v55_v18, %v52_v22  ;;  %v60_v25 = vmul.f32 %v56_v19, %v52_v22  ;;  %v411_v27 = vld [vmem:[#allocation2 + $0x40] sm:$0xff] }
  0x15   :  { %206 = vmatpush.bf16.msra.mxu1 %v416_v5  ;;  %v419_v31 = vld [vmem:[#allocation4] sm:$0xff] }
  0x16   :  { %289 = vmatpush.bf16.msra.mxu2 %v424_v10  ;;  %v61_v28 = vpack.c.bf16 %v59_v24, %v59_v24  ;;  %v62_v29 = vpack.c.bf16 %v60_v25, %v60_v25  ;;  %v431_v39 = vld [vmem:[%s540_s4] ss:$0 sm:$0xff] }
  0x18   :  { %194 = vmatpush.bf16.msra.mxu0 %v407_v8 }
  0x19   :  { %207 = vmatpush.bf16.msra.mxu1 %v415_v9 }
  0x1a   :  { %290 = vmatpush.bf16.msra.mxu2 %v423_v13 }
  0x1c   :  { %195 = vmatpush.bf16.msra.mxu0 %v406_v11 }
  0x1d   :  { %208 = vmatpush.bf16.msra.mxu1 %v414_v12 }
  0x1e   :  { %291 = vmatpush.bf16.msra.mxu2 %v422_v17 }
  0x20   :  { %196 = vmatpush.bf16.msra.mxu0 %v405_v14 }
  0x21   :  { %209 = vmatpush.bf16.msra.mxu1 %v413_v15 }
  0x22   :  { %292 = vmatpush.bf16.msra.mxu2 %v421_v23 }
  0x24   :  { %197 = vmatpush.bf16.msra.mxu0 %v404_v20 }
  0x25   :  { %210 = vmatpush.bf16.msra.mxu1 %v412_v21 }
  0x26   :  { %293 = vmatpush.bf16.msra.mxu2 %v420_v30 }
  0x28   :  { %198 = vmatpush.bf16.msra.mxu0 %v403_v26 }
  0x29   :  { %211 = vmatpush.bf16.msra.mxu1 %v411_v27 }
  0x2a   :  { %294 = vmatpush.bf16.msra.mxu2 %v419_v31 }
  0x2b   :  { %199 = vmatmul.bf16.vlgmr.msra.gmra.mxu0 %v61_v28 }
  0x2c   :  { %212 = vmatmul.bf16.vlgmr.msra.gmra.mxu1 %v62_v29 }
  0xa8   :  { %v200_v32 = vpop.f32.mrf.mxu0 }
  0xa9   :  { %v213_v33 = vpop.f32.mrf.mxu1 }
  0xaa   :  { %v214_v34 = vadd.f32 %v213_v33, %v200_v32 }
  0xac   :  { %v217_v35 = vand.u32 2147483647, %v214_v34 }
  0xae   :  { %v218_v36 = vpack.c.bf16 %v217_v35, %v217_v35 }
  0xb0   :  { %295 = vmatmul.bf16.vlgmr.msra.gmra.mxu2 %v218_v36  ;;  %v202_v37 = vpop.f32.mrf.mxu0 }
  0xb1   :  { %v215_v38 = vpop.f32.mrf.mxu1 }
 0x133   :  { %v296_v40 = vpop.f32.mrf.mxu2 }
 0x134   :  { %v297_v41 = vadd.f32 %v431_v39, %v296_v40 }
 0x136   :  { %300 = vst [vmem:[%s541_s5] sm:$0xff] %v297_v41 }
 0x13b   :  { %v298_v42 = vpop.f32.mrf.mxu2 }
 0x13c   :  { %305 = vsyncpa [#allocation3], 1 }
 0x13d   :  { %306 = vsyncpa [#allocation5], 1 }

</bundles_post_ra>
